<compile_context>
chip_gen: v7x
topology: tpu7x:2x2x1
jax: 0.10.0
libtpu: 0.0.40
codegen_flags: <defaults>
</compile_context>

<pallas_src>
import jax
import jax.numpy as jnp
from jax.experimental import pallas as pl
from jax.experimental.pallas import tpu as pltpu

NUM_PARTICLES = 32
BATCH = 4                        # power of two: in-kernel %/// use bit ops
N = NUM_PARTICLES * BATCH        # 128 rows -> exactly one lane dimension
H_DIM = 1                        # hidden_size (module default)
IN_SIZE = 1                      # input_size (module default)
EXT_OBS = 1                      # ext_obs (module default)
ALPHA = 0.1                      # resamp_alpha
LOG2B = BATCH.bit_length() - 1

assert BATCH & (BATCH - 1) == 0, "BATCH must be a power of two"
assert N == 128, "design assumes particles*batch == 128 lanes"

# ------------- packed parameter buffer: one [88, 40] f32 slab (single DMA) ---
# rows 0..39 hold column-vector params, one per lane-column:
#   col0 wt1[25]  col1 bt1[25]  col2 bt2[15]  col3 wt3[15]
#   col4 wo1h[40] col5 wo1x[40] col6 bo1[40]  col7 bo2[25]  col8 wo3[25]
#   col9 scalars rows 0..4: [bt3, wv_h, wv_x, bv, bo3]
# 8-row-aligned matrix blocks:
#   rows 40..54 : fc_trans_l2 weight [15,25]
#   rows 56..80 : fc_obs_l2  weight [25,40]
P_ROWS, P_COLS = 88, 40
_WT2_ROW, _WO2_ROW = 40, 56


# ---------------------------------------------------------------- kernel ----
def _pfrnn_kernel(state_ref, gum_ref, prm_ref, out_ref):
    f32 = jnp.float32
    sig = jax.nn.sigmoid
    K, B = NUM_PARTICLES, BATCH
    kinv = (1.0 - ALPHA) / K

    h0 = state_ref[0:1, :]               # [1,128]  row i = k*B + b
    x = state_ref[1:2, :]
    p0 = state_ref[2:3, :]
    eps = state_ref[3:4, :]               # already N(0,1)/3

    def col(c, n):                         # [n,1] column parameter
        return prm_ref[0:n, c:c + 1]

    def sc(r):                             # [1,1] scalar parameter
        return prm_ref[r:r + 1, 9:10]

    wt1, bt1 = col(0, 25), col(1, 25)
    bt2, wt3 = col(2, 15), col(3, 15)
    wo1h, wo1x, bo1 = col(4, 40), col(5, 40), col(6, 40)
    bo2, wo3 = col(7, 25), col(8, 25)
    bt3, wvh, wvx, bv, bo3 = sc(0), sc(1), sc(2), sc(3), sc(4)
    wt2 = prm_ref[_WT2_ROW:_WT2_ROW + 15, 0:25]     # [15,25]
    wo2 = prm_ref[_WO2_ROW:_WO2_ROW + 25, 0:40]     # [25,40]

    # fc_trans: Linear(1,25)->Sig->Linear(25,15)->Sig->Linear(15,1)
    t = sig(wt1 * h0 + bt1)                                             # [25,128]
    t = sig(jnp.dot(wt2, t, preferred_element_type=f32) + bt2)          # [15,128]
    h1 = jnp.sum(t * wt3, axis=0, keepdims=True) + bt3                  # [1,128]

    # fc_var(concat(h0, x)) -> Sigmoid ; std = softplus(var)
    var = sig(wvh * h0 + wvx * x + bv)
    std = jnp.log(1.0 + jnp.exp(var))       # softplus (var in (0,1): no overflow)
    h1 = h1 + std * eps

    # fc_obs(concat(h1, x)): Lin(2,40)->Sig->Lin(40,25)->Sig->Lin(25,1)->Sig
    o = sig(wo1h * h1 + wo1x * x + bo1)                                 # [40,128]
    o = sig(jnp.dot(wo2, o, preferred_element_type=f32) + bo2)          # [25,128]
    obs = sig(jnp.sum(o * wo3, axis=0, keepdims=True) + bo3)            # [1,128]

    # p1 = obs*p0, normalized per batch (rows sharing i % B), lane-dense results
    src = jax.lax.broadcasted_iota(jnp.int32, (N, N), 0)   # source row j
    dst = jax.lax.broadcasted_iota(jnp.int32, (N, N), 1)   # destination lane i
    same_b = ((src & (B - 1)) == (dst & (B - 1))).astype(f32)           # [128,128]

    p1 = obs * p0
    p1 = p1 / jnp.dot(p1, same_b, preferred_element_type=f32)           # [1,128]

    # Soft resampling: torch.multinomial(q, K, replacement=True) via Gumbel-max.
    # q_k(b) = alpha*p1[k*B+b] + (1-alpha)/K ; candidate particle k on sublanes.
    q = ALPHA * p1 + kinv
    logq = jnp.log(q)                                                    # 128 EUP ops
    kk = jax.lax.broadcasted_iota(jnp.int32, (K, N), 0)    # candidate k
    jj = jax.lax.broadcasted_iota(jnp.int32, (K, N), 1)    # source row j
    part = ((jj >> LOG2B) == kk).astype(f32)               # j // B == k
    # logq_grid[k, i] = logq[k*B + i%B]  (one lane-dense MXU dot)
    logq_grid = jnp.dot(part * logq, same_b, preferred_element_type=f32)  # [32,128]

    scores = logq_grid + gum_ref[...]                                    # [32,128]
    smax = jnp.max(scores, axis=0, keepdims=True)                        # [1,128]
    kf = kk.astype(f32)
    selk = jnp.min(jnp.where(scores >= smax, kf, float(K)),
                   axis=0, keepdims=True).astype(jnp.int32)              # [1,128]

    # fused gather of (h1, p1): one-hot G[j,i] = (j == selk[i]*B + i%B)
    lane = jax.lax.broadcasted_iota(jnp.int32, (1, N), 1)
    flat_src = selk * B + (lane & (B - 1))                               # [1,128] int32
    gather = (src == flat_src).astype(f32)                               # [128,128]
    sel = jnp.dot(jnp.concatenate([h1, p1], axis=0), gather,
                  preferred_element_type=f32)                            # [2,128]
    h_new = sel[0:1, :]
    p_sel = sel[1:2, :]

    # importance re-weighting — matches the torch reference literally
    # (torch.exp on the normalized weights), then per-batch renormalization.
    pn = jnp.exp(p_sel)
    pn = pn / (ALPHA * pn + kinv)
    pn = pn / jnp.dot(pn, same_b, preferred_element_type=f32)

    out_ref[...] = jnp.concatenate([h_new, pn], axis=0)                  # [2,128]


# --------------------------------------------------------------- wrapper ----
def init_params(key):
    # PyTorch nn.Linear default init: U(-1/sqrt(fan_in), 1/sqrt(fan_in)), shapes [out, in].
    dims = {
        "t1": (25, H_DIM), "t2": (15, 25), "t3": (1, 15),
        "v1": (1, H_DIM + 1),
        "o1": (40, EXT_OBS + H_DIM), "o2": (25, 40), "o3": (1, 25),
    }
    params = {}
    keys = jax.random.split(key, 2 * len(dims))
    for i, (name, (fan_out, fan_in)) in enumerate(dims.items()):
        bound = 1.0 / (fan_in ** 0.5)
        params["w" + name] = jax.random.uniform(
            keys[2 * i], (fan_out, fan_in), jnp.float32, -bound, bound)
        params["b" + name] = jax.random.uniform(
            keys[2 * i + 1], (fan_out,), jnp.float32, -bound, bound)
    return params


def pack_params(p):
    """Pack all 14 weights/biases into one [88, 40] f32 buffer (single DMA)."""
    buf = jnp.zeros((P_ROWS, P_COLS), jnp.float32)

    def setcol(b, c, v):
        return b.at[0:v.shape[0], c].set(v)

    buf = setcol(buf, 0, p["wt1"][:, 0])
    buf = setcol(buf, 1, p["bt1"])
    buf = setcol(buf, 2, p["bt2"])
    buf = setcol(buf, 3, p["wt3"][0, :])
    buf = setcol(buf, 4, p["wo1"][:, 0])     # multiplies h1
    buf = setcol(buf, 5, p["wo1"][:, 1])     # multiplies input_
    buf = setcol(buf, 6, p["bo1"])
    buf = setcol(buf, 7, p["bo2"])
    buf = setcol(buf, 8, p["wo3"][0, :])
    scal = jnp.stack([p["bt3"][0], p["wv1"][0, 0], p["wv1"][0, 1],
                      p["bv1"][0], p["bo3"][0]]).astype(jnp.float32)
    buf = buf.at[0:5, 9].set(scal)
    buf = buf.at[_WT2_ROW:_WT2_ROW + 15, 0:25].set(p["wt2"])
    buf = buf.at[_WO2_ROW:_WO2_ROW + 25, 0:40].set(p["wo2"])
    return buf


_COST = pl.CostEstimate(flops=1_700_000, transcendentals=15_000, bytes_accessed=34_000)


@jax.jit
def pfrnn_forward(packed_params, input_, h0, p0, key):
    keps, kgum = jax.random.split(key)
    eps = jax.random.normal(keps, (1, N), jnp.float32) * (1.0 / 3.0)
    gum = jax.random.gumbel(kgum, (NUM_PARTICLES, N), jnp.float32)
    # pack h0 / input / p0 / eps into one lane-dense [4, 128] slab
    state = jnp.concatenate(
        [h0.reshape(1, N), input_.reshape(1, N), p0.reshape(1, N), eps], axis=0)

    out = pl.pallas_call(
        _pfrnn_kernel,
        out_shape=jax.ShapeDtypeStruct((2, N), jnp.float32),
        in_specs=[
            pl.BlockSpec(memory_space=pltpu.MemorySpace.VMEM),   # state slab
            pl.BlockSpec(memory_space=pltpu.MemorySpace.VMEM),   # gumbel noise
            pl.BlockSpec(memory_space=pltpu.MemorySpace.VMEM),   # packed params
        ],
        out_specs=pl.BlockSpec(memory_space=pltpu.MemorySpace.VMEM),
        cost_estimate=_COST,
    )(state, gum, packed_params)

    h1 = out[0:1, :].reshape(N, H_DIM)
    p1 = out[1:2, :].reshape(N, 1)
    return h1, p1


if __name__ == "__main__":
    key = jax.random.PRNGKey(0)
    kp, kh, kx, kr = jax.random.split(key, 4)
    params = init_params(kp)
    packed = pack_params(params)            # packed once, reused every step

    h0 = jax.random.normal(kh, (N, H_DIM), dtype=jnp.float32)
    x = jax.random.normal(kx, (N, IN_SIZE), dtype=jnp.float32)
    p0 = jnp.full((N, 1), 1.0 / NUM_PARTICLES, dtype=jnp.float32)

    h1, p1 = pfrnn_forward(packed, x, h0, p0, kr)
    jax.block_until_ready((h1, p1))

    assert h1.shape == (N, H_DIM) and p1.shape == (N, 1)
    assert bool(jnp.all(jnp.isfinite(h1))) and bool(jnp.all(jnp.isfinite(p1)))
    batch_sums = p1.reshape(NUM_PARTICLES, BATCH).sum(axis=0)
    assert bool(jnp.allclose(batch_sums, 1.0, atol=1e-4))
    print("KERNEL_OK")
</pallas_src>

<mosaic_0001>
module attributes {stable_mosaic.version = 11 : i64} {
  func.func @_pfrnn_kernel(%arg0: memref<4x128xf32, #tpu.memory_space<vmem>>, %arg1: memref<32x128xf32, #tpu.memory_space<vmem>>, %arg2: memref<88x40xf32, #tpu.memory_space<vmem>>, %arg3: memref<2x128xf32, #tpu.memory_space<vmem>>) attributes {dimension_semantics = [], scalar_prefetch = 0 : i64, scratch_operands = 0 : i64, tpu.core_type = #tpu.core_type<tc>} {
    %c0 = arith.constant 0 : index
    %c0_0 = arith.constant 0 : index
    %0 = vector.load %arg0[%c0, %c0_0] : memref<4x128xf32, #tpu.memory_space<vmem>>, vector<1x128xf32>
    %c1 = arith.constant 1 : index
    %c0_1 = arith.constant 0 : index
    %1 = vector.load %arg0[%c1, %c0_1] : memref<4x128xf32, #tpu.memory_space<vmem>>, vector<1x128xf32>
    %c2 = arith.constant 2 : index
    %c0_2 = arith.constant 0 : index
    %2 = vector.load %arg0[%c2, %c0_2] : memref<4x128xf32, #tpu.memory_space<vmem>>, vector<1x128xf32>
    %c3 = arith.constant 3 : index
    %c0_3 = arith.constant 0 : index
    %3 = vector.load %arg0[%c3, %c0_3] : memref<4x128xf32, #tpu.memory_space<vmem>>, vector<1x128xf32>
    %c0_4 = arith.constant 0 : index
    %c0_5 = arith.constant 0 : index
    %4 = vector.load %arg2[%c0_4, %c0_5] : memref<88x40xf32, #tpu.memory_space<vmem>>, vector<25x1xf32>
    %c0_6 = arith.constant 0 : index
    %c1_7 = arith.constant 1 : index
    %5 = vector.load %arg2[%c0_6, %c1_7] : memref<88x40xf32, #tpu.memory_space<vmem>>, vector<25x1xf32>
    %c0_8 = arith.constant 0 : index
    %c2_9 = arith.constant 2 : index
    %6 = vector.load %arg2[%c0_8, %c2_9] : memref<88x40xf32, #tpu.memory_space<vmem>>, vector<15x1xf32>
    %c0_10 = arith.constant 0 : index
    %c3_11 = arith.constant 3 : index
    %7 = vector.load %arg2[%c0_10, %c3_11] : memref<88x40xf32, #tpu.memory_space<vmem>>, vector<15x1xf32>
    %c0_12 = arith.constant 0 : index
    %c4 = arith.constant 4 : index
    %8 = vector.load %arg2[%c0_12, %c4] : memref<88x40xf32, #tpu.memory_space<vmem>>, vector<40x1xf32>
    %c0_13 = arith.constant 0 : index
    %c5 = arith.constant 5 : index
    %9 = vector.load %arg2[%c0_13, %c5] : memref<88x40xf32, #tpu.memory_space<vmem>>, vector<40x1xf32>
    %c0_14 = arith.constant 0 : index
    %c6 = arith.constant 6 : index
    %10 = vector.load %arg2[%c0_14, %c6] : memref<88x40xf32, #tpu.memory_space<vmem>>, vector<40x1xf32>
    %c0_15 = arith.constant 0 : index
    %c7 = arith.constant 7 : index
    %11 = vector.load %arg2[%c0_15, %c7] : memref<88x40xf32, #tpu.memory_space<vmem>>, vector<25x1xf32>
    %c0_16 = arith.constant 0 : index
    %c8 = arith.constant 8 : index
    %12 = vector.load %arg2[%c0_16, %c8] : memref<88x40xf32, #tpu.memory_space<vmem>>, vector<25x1xf32>
    %c0_17 = arith.constant 0 : index
    %c9 = arith.constant 9 : index
    %13 = vector.load %arg2[%c0_17, %c9] : memref<88x40xf32, #tpu.memory_space<vmem>>, vector<1x1xf32>
    %c1_18 = arith.constant 1 : index
    %c9_19 = arith.constant 9 : index
    %14 = vector.load %arg2[%c1_18, %c9_19] : memref<88x40xf32, #tpu.memory_space<vmem>>, vector<1x1xf32>
    %c2_20 = arith.constant 2 : index
    %c9_21 = arith.constant 9 : index
    %15 = vector.load %arg2[%c2_20, %c9_21] : memref<88x40xf32, #tpu.memory_space<vmem>>, vector<1x1xf32>
    %c3_22 = arith.constant 3 : index
    %c9_23 = arith.constant 9 : index
    %16 = vector.load %arg2[%c3_22, %c9_23] : memref<88x40xf32, #tpu.memory_space<vmem>>, vector<1x1xf32>
    %c4_24 = arith.constant 4 : index
    %c9_25 = arith.constant 9 : index
    %17 = vector.load %arg2[%c4_24, %c9_25] : memref<88x40xf32, #tpu.memory_space<vmem>>, vector<1x1xf32>
    %c40 = arith.constant 40 : index
    %c0_26 = arith.constant 0 : index
    %18 = vector.load %arg2[%c40, %c0_26] : memref<88x40xf32, #tpu.memory_space<vmem>>, vector<15x25xf32>
    %c56 = arith.constant 56 : index
    %c0_27 = arith.constant 0 : index
    %19 = vector.load %arg2[%c56, %c0_27] : memref<88x40xf32, #tpu.memory_space<vmem>>, vector<25x40xf32>
    %20 = vector.broadcast %4 : vector<25x1xf32> to vector<25x128xf32>
    %21 = vector.broadcast %0 : vector<1x128xf32> to vector<25x128xf32>
    %22 = arith.mulf %20, %21 : vector<25x128xf32>
    %23 = vector.broadcast %5 : vector<25x1xf32> to vector<25x128xf32>
    %24 = arith.addf %22, %23 : vector<25x128xf32>
    %25 = arith.negf %24 : vector<25x128xf32>
    %26 = math.exp %25 : vector<25x128xf32>
    %cst = arith.constant 1.000000e+00 : f32
    %27 = vector.broadcast %cst : f32 to vector<25x128xf32>
    %28 = arith.addf %27, %26 : vector<25x128xf32>
    %29 = arith.divf %27, %28 : vector<25x128xf32>
    %cst_28 = arith.constant dense<0.000000e+00> : vector<15x128xf32>
    %30 = tpu.matmul %18, %29, %cst_28 {dimension_numbers = #tpu.dot_dimension_numbers<[1], [0], [0], [1], [0, 0, 1, 1], [], []>} : vector<15x25xf32>, vector<25x128xf32>, vector<15x128xf32> -> vector<15x128xf32>
    %31 = vector.broadcast %6 : vector<15x1xf32> to vector<15x128xf32>
    %32 = arith.addf %30, %31 : vector<15x128xf32>
    %33 = arith.negf %32 : vector<15x128xf32>
    %34 = math.exp %33 : vector<15x128xf32>
    %cst_29 = arith.constant 1.000000e+00 : f32
    %35 = vector.broadcast %cst_29 : f32 to vector<15x128xf32>
    %36 = arith.addf %35, %34 : vector<15x128xf32>
    %37 = arith.divf %35, %36 : vector<15x128xf32>
    %38 = vector.broadcast %7 : vector<15x1xf32> to vector<15x128xf32>
    %39 = arith.mulf %37, %38 : vector<15x128xf32>
    %cst_30 = arith.constant dense<0.000000e+00> : vector<128xf32>
    %40 = vector.multi_reduction <add>, %39, %cst_30 [0] : vector<15x128xf32> to vector<128xf32>
    %41 = vector.shape_cast %40 : vector<128xf32> to vector<1x128xf32>
    %42 = vector.broadcast %13 : vector<1x1xf32> to vector<1x128xf32>
    %43 = arith.addf %41, %42 : vector<1x128xf32>
    %44 = vector.broadcast %14 : vector<1x1xf32> to vector<1x128xf32>
    %45 = arith.mulf %44, %0 : vector<1x128xf32>
    %46 = vector.broadcast %15 : vector<1x1xf32> to vector<1x128xf32>
    %47 = arith.mulf %46, %1 : vector<1x128xf32>
    %48 = arith.addf %45, %47 : vector<1x128xf32>
    %49 = vector.broadcast %16 : vector<1x1xf32> to vector<1x128xf32>
    %50 = arith.addf %48, %49 : vector<1x128xf32>
    %51 = arith.negf %50 : vector<1x128xf32>
    %52 = math.exp %51 : vector<1x128xf32>
    %cst_31 = arith.constant 1.000000e+00 : f32
    %53 = vector.broadcast %cst_31 : f32 to vector<1x128xf32>
    %54 = arith.addf %53, %52 : vector<1x128xf32>
    %55 = arith.divf %53, %54 : vector<1x128xf32>
    %56 = math.exp %55 : vector<1x128xf32>
    %cst_32 = arith.constant 1.000000e+00 : f32
    %57 = vector.broadcast %cst_32 : f32 to vector<1x128xf32>
    %58 = arith.addf %57, %56 : vector<1x128xf32>
    %59 = math.log %58 : vector<1x128xf32>
    %60 = arith.mulf %59, %3 : vector<1x128xf32>
    %61 = arith.addf %43, %60 : vector<1x128xf32>
    %62 = vector.broadcast %8 : vector<40x1xf32> to vector<40x128xf32>
    %63 = vector.broadcast %61 : vector<1x128xf32> to vector<40x128xf32>
    %64 = arith.mulf %62, %63 : vector<40x128xf32>
    %65 = vector.broadcast %9 : vector<40x1xf32> to vector<40x128xf32>
    %66 = vector.broadcast %1 : vector<1x128xf32> to vector<40x128xf32>
    %67 = arith.mulf %65, %66 : vector<40x128xf32>
    %68 = arith.addf %64, %67 : vector<40x128xf32>
    %69 = vector.broadcast %10 : vector<40x1xf32> to vector<40x128xf32>
    %70 = arith.addf %68, %69 : vector<40x128xf32>
    %71 = arith.negf %70 : vector<40x128xf32>
    %72 = math.exp %71 : vector<40x128xf32>
    %cst_33 = arith.constant 1.000000e+00 : f32
    %73 = vector.broadcast %cst_33 : f32 to vector<40x128xf32>
    %74 = arith.addf %73, %72 : vector<40x128xf32>
    %75 = arith.divf %73, %74 : vector<40x128xf32>
    %cst_34 = arith.constant dense<0.000000e+00> : vector<25x128xf32>
    %76 = tpu.matmul %19, %75, %cst_34 {dimension_numbers = #tpu.dot_dimension_numbers<[1], [0], [0], [1], [0, 0, 1, 1], [], []>} : vector<25x40xf32>, vector<40x128xf32>, vector<25x128xf32> -> vector<25x128xf32>
    %77 = vector.broadcast %11 : vector<25x1xf32> to vector<25x128xf32>
    %78 = arith.addf %76, %77 : vector<25x128xf32>
    %79 = arith.negf %78 : vector<25x128xf32>
    %80 = math.exp %79 : vector<25x128xf32>
    %cst_35 = arith.constant 1.000000e+00 : f32
    %81 = vector.broadcast %cst_35 : f32 to vector<25x128xf32>
    %82 = arith.addf %81, %80 : vector<25x128xf32>
    %83 = arith.divf %81, %82 : vector<25x128xf32>
    %84 = vector.broadcast %12 : vector<25x1xf32> to vector<25x128xf32>
    %85 = arith.mulf %83, %84 : vector<25x128xf32>
    %cst_36 = arith.constant dense<0.000000e+00> : vector<128xf32>
    %86 = vector.multi_reduction <add>, %85, %cst_36 [0] : vector<25x128xf32> to vector<128xf32>
    %87 = vector.shape_cast %86 : vector<128xf32> to vector<1x128xf32>
    %88 = vector.broadcast %17 : vector<1x1xf32> to vector<1x128xf32>
    %89 = arith.addf %87, %88 : vector<1x128xf32>
    %90 = arith.negf %89 : vector<1x128xf32>
    %91 = math.exp %90 : vector<1x128xf32>
    %cst_37 = arith.constant 1.000000e+00 : f32
    %92 = vector.broadcast %cst_37 : f32 to vector<1x128xf32>
    %93 = arith.addf %92, %91 : vector<1x128xf32>
    %94 = arith.divf %92, %93 : vector<1x128xf32>
    %95 = tpu.iota {dimensions = array<i32: 0>} : vector<128x128xi32>
    %96 = tpu.iota {dimensions = array<i32: 1>} : vector<128x128xi32>
    %c3_i32 = arith.constant 3 : i32
    %97 = vector.broadcast %c3_i32 : i32 to vector<128x128xi32>
    %98 = arith.andi %95, %97 : vector<128x128xi32>
    %c3_i32_38 = arith.constant 3 : i32
    %99 = vector.broadcast %c3_i32_38 : i32 to vector<128x128xi32>
    %100 = arith.andi %96, %99 : vector<128x128xi32>
    %101 = arith.cmpi eq, %98, %100 : vector<128x128xi32>
    %102 = arith.extui %101 : vector<128x128xi1> to vector<128x128xi32>
    %103 = arith.sitofp %102 : vector<128x128xi32> to vector<128x128xf32>
    %104 = arith.mulf %94, %2 : vector<1x128xf32>
    %cst_39 = arith.constant dense<0.000000e+00> : vector<1x128xf32>
    %105 = tpu.matmul %104, %103, %cst_39 {dimension_numbers = #tpu.dot_dimension_numbers<[1], [0], [0], [1], [0, 0, 1, 1], [], []>} : vector<1x128xf32>, vector<128x128xf32>, vector<1x128xf32> -> vector<1x128xf32>
    %106 = arith.divf %104, %105 : vector<1x128xf32>
    %cst_40 = arith.constant 1.000000e-01 : f32
    %107 = vector.broadcast %cst_40 : f32 to vector<1x128xf32>
    %108 = arith.mulf %107, %106 : vector<1x128xf32>
    %cst_41 = arith.constant 2.812500e-02 : f32
    %109 = vector.broadcast %cst_41 : f32 to vector<1x128xf32>
    %110 = arith.addf %108, %109 : vector<1x128xf32>
    %111 = math.log %110 : vector<1x128xf32>
    %112 = tpu.iota {dimensions = array<i32: 0>} : vector<32x128xi32>
    %113 = tpu.iota {dimensions = array<i32: 1>} : vector<32x128xi32>
    %c2_i32 = arith.constant 2 : i32
    %114 = vector.broadcast %c2_i32 : i32 to vector<32x128xi32>
    %115 = arith.shrsi %113, %114 : vector<32x128xi32>
    %116 = arith.cmpi eq, %115, %112 : vector<32x128xi32>
    %117 = arith.extui %116 : vector<32x128xi1> to vector<32x128xi32>
    %118 = arith.sitofp %117 : vector<32x128xi32> to vector<32x128xf32>
    %119 = vector.broadcast %111 : vector<1x128xf32> to vector<32x128xf32>
    %120 = arith.mulf %118, %119 : vector<32x128xf32>
    %cst_42 = arith.constant dense<0.000000e+00> : vector<32x128xf32>
    %121 = tpu.matmul %120, %103, %cst_42 {dimension_numbers = #tpu.dot_dimension_numbers<[1], [0], [0], [1], [0, 0, 1, 1], [], []>} : vector<32x128xf32>, vector<128x128xf32>, vector<32x128xf32> -> vector<32x128xf32>
    %c0_43 = arith.constant 0 : index
    %c0_44 = arith.constant 0 : index
    %122 = vector.load %arg1[%c0_43, %c0_44] : memref<32x128xf32, #tpu.memory_space<vmem>>, vector<32x128xf32>
    %123 = arith.addf %121, %122 : vector<32x128xf32>
    %cst_45 = arith.constant dense<0xFF800000> : vector<128xf32>
    %124 = vector.multi_reduction <maximumf>, %123, %cst_45 [0] : vector<32x128xf32> to vector<128xf32>
    %125 = vector.shape_cast %124 : vector<128xf32> to vector<1x128xf32>
    %126 = arith.sitofp %112 : vector<32x128xi32> to vector<32x128xf32>
    %127 = vector.broadcast %125 : vector<1x128xf32> to vector<32x128xf32>
    %128 = arith.cmpf oge, %123, %127 : vector<32x128xf32>
    %cst_46 = arith.constant 3.200000e+01 : f32
    %129 = vector.broadcast %cst_46 : f32 to vector<32x128xf32>
    %130 = arith.select %128, %126, %129 : vector<32x128xi1>, vector<32x128xf32>
    %cst_47 = arith.constant dense<0x7F800000> : vector<128xf32>
    %131 = vector.multi_reduction <minimumf>, %130, %cst_47 [0] : vector<32x128xf32> to vector<128xf32>
    %132 = vector.shape_cast %131 : vector<128xf32> to vector<1x128xf32>
    %133 = arith.fptosi %132 : vector<1x128xf32> to vector<1x128xi32>
    %134 = tpu.iota {dimensions = array<i32: 1>} : vector<1x128xi32>
    %c4_i32 = arith.constant 4 : i32
    %135 = vector.broadcast %c4_i32 : i32 to vector<1x128xi32>
    %136 = arith.muli %133, %135 : vector<1x128xi32>
    %c3_i32_48 = arith.constant 3 : i32
    %137 = vector.broadcast %c3_i32_48 : i32 to vector<1x128xi32>
    %138 = arith.andi %134, %137 : vector<1x128xi32>
    %139 = arith.addi %136, %138 : vector<1x128xi32>
    %140 = vector.broadcast %139 : vector<1x128xi32> to vector<128x128xi32>
    %141 = arith.cmpi eq, %95, %140 : vector<128x128xi32>
    %142 = arith.extui %141 : vector<128x128xi1> to vector<128x128xi32>
    %143 = arith.sitofp %142 : vector<128x128xi32> to vector<128x128xf32>
    %144 = tpu.concatenate %61, %106 in 0 : vector<1x128xf32>, vector<1x128xf32> -> vector<2x128xf32>
    %cst_49 = arith.constant dense<0.000000e+00> : vector<2x128xf32>
    %145 = tpu.matmul %144, %143, %cst_49 {dimension_numbers = #tpu.dot_dimension_numbers<[1], [0], [0], [1], [0, 0, 1, 1], [], []>} : vector<2x128xf32>, vector<128x128xf32>, vector<2x128xf32> -> vector<2x128xf32>
    %146 = vector.extract_strided_slice %145 {offsets = [0, 0], sizes = [1, 128], strides = [1, 1]} : vector<2x128xf32> to vector<1x128xf32>
    %147 = vector.extract_strided_slice %145 {offsets = [1, 0], sizes = [1, 128], strides = [1, 1]} : vector<2x128xf32> to vector<1x128xf32>
    %148 = math.exp %147 : vector<1x128xf32>
    %cst_50 = arith.constant 1.000000e-01 : f32
    %149 = vector.broadcast %cst_50 : f32 to vector<1x128xf32>
    %150 = arith.mulf %149, %148 : vector<1x128xf32>
    %cst_51 = arith.constant 2.812500e-02 : f32
    %151 = vector.broadcast %cst_51 : f32 to vector<1x128xf32>
    %152 = arith.addf %150, %151 : vector<1x128xf32>
    %153 = arith.divf %148, %152 : vector<1x128xf32>
    %cst_52 = arith.constant dense<0.000000e+00> : vector<1x128xf32>
    %154 = tpu.matmul %153, %103, %cst_52 {dimension_numbers = #tpu.dot_dimension_numbers<[1], [0], [0], [1], [0, 0, 1, 1], [], []>} : vector<1x128xf32>, vector<128x128xf32>, vector<1x128xf32> -> vector<1x128xf32>
    %155 = arith.divf %153, %154 : vector<1x128xf32>
    %156 = tpu.concatenate %146, %155 in 0 : vector<1x128xf32>, vector<1x128xf32> -> vector<2x128xf32>
    %c0_53 = arith.constant 0 : index
    %c0_54 = arith.constant 0 : index
    %157 = vector.load %arg3[%c0_53, %c0_54] : memref<2x128xf32, #tpu.memory_space<vmem>>, vector<2x128xf32>
    tpu.vector_store %arg3[%c0_53, %c0_54], %156 {strides = array<i32>} : memref<2x128xf32, #tpu.memory_space<vmem>>, vector<2x128xf32>,
    return
  }
}

</mosaic_0001>

<bundles_post_ra>
// kernel: pfrnn_forward.3
= control target key start
LH: loop header
LB: loop body
LE: loop exit
PB: predicated region body
PF: predicated region fallthrough
CT: control target
= control target key end

     0   :  { %v1717_v0 = vmov 1   ;;  %v1718_v1 = vmov 0   ;;  %vm117_vm0 = vcmask 203776   ;;  %v1719_v9 = vmov 9   ;;  %s2184_s2 = inlined_call_operand.vmem [shape: f32[88,40], index: 2, kind: input, shape index: {}]   ;;  %s2185_s0 = inlined_call_operand.vmem [shape: f32[4,128], index: 0, kind: input, shape index: {}]   ;;  %s2186_s1 = inlined_call_operand.vmem [shape: f32[32,128], index: 1, kind: input, shape index: {}]   ;;  %s2187_s3 = inlined_call_operand.vmem [shape: f32[2,128], index: 3, kind: output, shape index: {}]  }
   0x1   :  { %1608 = vset.pattern.permute.xlu1 %v1717_v0  ;;  %1607 = vset.pattern.permute.xlu0 %v1718_v1  ;;  %v1755_v2 = vld [vmem:[%s2184_s2] sm:$0xff]  ;;  %v1762_v3 = vld [vmem:[%s2184_s2 + $0x8] sm:$0xff]  ;;  %v1769_v4 = vld [vmem:[%s2184_s2 + $0x10] sm:$0xff]  ;;  %v1720_v11 = vmov 2   ;;  %v1721_v14 = vmov 3   ;;  %v1722_v15 = vmov 5   ;;  %v56_v20 = vlaneseq }
   0x2   :  { %65 = vperm.xlu1 %1608, %v1755_v2   ;;  %38 = vperm.xlu0 %1607, %v1755_v2   ;;  %v1774_v5 = vld [vmem:[%s2184_s2 + $0x18] sm:$0x1]  ;;  %v30_v6 = vld [vmem:[%s2184_s2 + $0x28] sm:$0xff]  ;;  %v26_v7 = vld [vmem:[%s2184_s2 + $0x1] sm:$0x1]  ;;  %v1723_v17 = vmov 4  }
   0x3   :  { %1306 = vmatprep.mubr.msk.f32.mxu0 %vm117_vm0, %v30_v6  ;;  %v27_v8 = vld [vmem:[%s2184_s2 + $0x2] sm:$0x1]  ;;  %v28_v10 = vld [vmem:[%s2184_s2 + $0x3] sm:$0x1]  ;;  %v22_v12 = vld [vmem:[%s2184_s2 + $0x8] sm:$0x7f] }
   0x4   :  { %v25_v13 = vld [vmem:[%s2184_s2] sm:$0x1]  ;;  %v23_v16 = vld [vmem:[%s2184_s2 + $0x18] sm:$0xff]  ;;  %v1724_v18 = vmov 6   ;;  %v1820_v21 = vshrl.u32 %v56_v20, 7  ;;  %vm124_vm1 = vcmask 1040384  }
   0x5   :  { %v24_v19 = vld [vmem:[%s2184_s2 + $0x20] sm:$0xff]  ;;  %vm1725_vm2 = vmmov 1   ;;  %v31_v59 = vld [vmem:[%s2184_s2 + $0x30] sm:$0x7f]  ;;  %vm408_vm4 = vcmask 326656   ;;  %vm225_vm5 = vcmask 1046528  }
   0x6   :  { %69 = vperm.xlu1 %1608, %v1762_v3   ;;  %43 = vperm.xlu0 %1607, %v1762_v3   ;;  %v1823_v22 = vsub.s32 0, %v1820_v21  ;;  %v14_v23 = vld [vmem:[%s2185_s0] sm:$0x1]  ;;  %vm1473_vm3 = vmpackc.low %vm124_vm1, %vm1725_vm2  ;;  %v1837_v62 = vld [vmem:[%s2185_s0 + $0x1] sm:$0x1] }
   0x8   :  { %v59_v24 = vrot.slane %v14_v23, %v1823_v22 }
   0xa   :  { %1609 = vset.pattern.permute.xlu1 %v1718_v1  ;;  %48 = vperm.xlu0 %1607, %v1769_v4  }
   0xb   :  { %53 = vperm.xlu1 %1609, %v1774_v5  }
   0xe   :  { %1610 = vset.pattern.permute.xlu0 %v1717_v0 }
   0xf   :  { %1611 = vset.pattern.permute.xlu1 %v1717_v0  ;;  %73 = vperm.xlu0 %1610, %v1769_v4  }
  0x10   :  { %77 = vperm.xlu1 %1611, %v1774_v5  }
  0x13   :  { %1613 = vset.pattern.permute.xlu0 %v1719_v9 }
  0x14   :  { %1612 = vset.pattern.permute.xlu1 %v1719_v9  ;;  %248 = vperm.xlu0 %1613, %v27_v8  }
  0x15   :  { %242 = vperm.xlu1 %1612, %v26_v7   ;;  %v32_v7 = vld [vmem:[%s2184_s2 + $0x38] sm:$0xff] }
  0x16   :  { %1319 = vmatprep.mubr.msk.f32.mxu1 %vm408_vm4, %v32_v7 }
  0x18   :  { %1615 = vset.pattern.permute.xlu0 %v1720_v11 }
  0x19   :  { %255 = vperm.xlu1 %1612, %v28_v10   ;;  %109 = vperm.xlu0 %1615, %v1755_v2  }
  0x1d   :  { %1614 = vset.pattern.permute.xlu1 %v1720_v11  ;;  %1617 = vset.pattern.permute.xlu0 %v1719_v9  ;;  %v1726_v11 = vmov 7  }
  0x1e   :  { %114 = vperm.xlu1 %1614, %v22_v12   ;;  %236 = vperm.xlu0 %1617, %v25_v13  }
  0x22   :  { %1616 = vset.pattern.permute.xlu1 %v1721_v14  ;;  %1619 = vset.pattern.permute.xlu0 %v1722_v15 }
  0x23   :  { %220 = vperm.xlu1 %1616, %v22_v12   ;;  %304 = vperm.xlu0 %1619, %v1755_v2   ;;  %v1727_v12 = vmov 8  }
  0x27   :  { %216 = vperm.xlu1 %1616, %v1755_v2   ;;  %1622 = vset.pattern.permute.xlu0 %v1723_v17 }
  0x28   :  { %286 = vperm.xlu0 %1622, %v23_v16  }
  0x2b   :  { %1618 = vset.pattern.permute.xlu1 %v1723_v17 }
  0x2c   :  { %273 = vperm.xlu1 %1618, %v1755_v2   ;;  %1624 = vset.pattern.permute.xlu0 %v1724_v18 }
  0x2d   :  { %338 = vperm.xlu0 %1624, %v1755_v2  }
  0x30   :  { %277 = vperm.xlu1 %1618, %v1762_v3  }
  0x31   :  { %350 = vperm.xlu0 %1624, %v23_v16  }
  0x34   :  { %1620 = vset.pattern.permute.xlu1 %v1722_v15 }
  0x35   :  { %308 = vperm.xlu1 %1620, %v1762_v3   ;;  %1627 = vset.pattern.permute.xlu0 %v1722_v15 }
  0x36   :  { %320 = vperm.xlu0 %1627, %v24_v19  }
  0x39   :  { %1621 = vset.pattern.permute.xlu1 %v1723_v17 }
  0x3a   :  { %281 = vperm.xlu1 %1621, %v1769_v4   ;;  %1630 = vset.pattern.permute.xlu0 %v1726_v11 }
  0x3b   :  { %397 = vperm.xlu0 %1630, %v1762_v3  }
  0x3e   :  { %1623 = vset.pattern.permute.xlu1 %v1722_v15 }
  0x3f   :  { %312 = vperm.xlu1 %1623, %v1769_v4   ;;  %1631 = vset.pattern.permute.xlu0 %v1727_v12 }
  0x40   :  { %531 = vperm.xlu0 %1631, %v1755_v2  }
  0x43   :  { %316 = vperm.xlu1 %1623, %v23_v16  }
  0x44   :  { %543 = vperm.xlu0 %1631, %v1774_v5  }
  0x47   :  { %1625 = vset.pattern.permute.xlu1 %v1724_v18 }
  0x48   :  { %342 = vperm.xlu1 %1625, %v1762_v3   ;;  %1634 = vset.pattern.permute.xlu0 %v1719_v9 }
  0x4c   :  { %346 = vperm.xlu1 %1625, %v1769_v4  }
  0x50   :  { %1626 = vset.pattern.permute.xlu1 %v1723_v17 }
  0x51   :  { %291 = vperm.xlu1 %1626, %v24_v19  }
  0x55   :  { %1628 = vset.pattern.permute.xlu1 %v1724_v18 }
  0x56   :  { %354 = vperm.xlu1 %1628, %v24_v19  }
  0x5a   :  { %1629 = vset.pattern.permute.xlu1 %v1726_v11 }
  0x5b   :  { %393 = vperm.xlu1 %1629, %v1755_v2   ;;  %v29_v2 = vld [vmem:[%s2184_s2 + $0x4] sm:$0x1] }
  0x5f   :  { %401 = vperm.xlu1 %1629, %v1769_v4  }
  0x63   :  { %405 = vperm.xlu1 %1629, %v1774_v5  }
  0x67   :  { %1632 = vset.pattern.permute.xlu1 %v1727_v12 }
  0x68   :  { %535 = vperm.xlu1 %1632, %v1762_v3  }
  0x6c   :  { %539 = vperm.xlu1 %1632, %v1769_v4  }
  0x70   :  { %1633 = vset.pattern.permute.xlu1 %v1719_v9 }
  0x71   :  { %562 = vperm.xlu1 %1633, %v29_v2  }
  0x81   :  { %v66_v25 = vpop.permute.xlu1 %65  ;;  %v39_v26 = vpop.permute.xlu0 %38 }
  0x82   :  { %v60_v27 = vmul.f32 %v59_v24, %v39_v26 }
  0x84   :  { %v80_v28 = vadd.f32 %v66_v25, %v60_v27 }
  0x85   :  { %v70_v29 = vpop.permute.xlu1 %69  ;;  %v44_v30 = vpop.permute.xlu0 %43 }
  0x86   :  { %v1088_v31 = vmul.f32 -1.442695, %v80_v28  ;;  %v61_v32 = vmul.f32 %v59_v24, %v44_v30 }
  0x88   :  { %1635 = vpow2.f32 %v1088_v31  ;;  %v81_v33 = vadd.f32 %v70_v29, %v61_v32 }
  0x89   :  { %v49_v34 = vpop.permute.xlu0 %48 }
  0x8a   :  { %v1089_v35 = vmul.f32 -1.442695, %v81_v33  ;;  %v54_v36 = vpop.permute.xlu1 %53  ;;  %v62_v37 = vmul.f32 %v59_v24, %v49_v34 }
  0x8b   :  { %v63_v38 = vmul.f32 %v59_v24, %v54_v36 }
  0x8c   :  { %1637 = vpow2.f32 %v1089_v35 }
  0x8e   :  { %v74_v39 = vpop.permute.xlu0 %73 }
  0x8f   :  { %v82_v40 = vadd.f32 %v74_v39, %v62_v37  ;;  %v78_v41 = vpop.permute.xlu1 %77 }
  0x90   :  { %v83_v42 = vadd.f32 %v78_v41, %v63_v38 }
  0x91   :  { %v1090_v43 = vmul.f32 -1.442695, %v82_v40 }
  0x92   :  { %v1636_v44 = vpop.eup %1635  ;;  %v1091_v45 = vmul.f32 -1.442695, %v83_v42 }
  0x93   :  { %1639 = vpow2.f32 %v1090_v43  ;;  %v96_v46 = vadd.f32 1.0, %v1636_v44  ;;  %v249_v61 = vpop.permute.xlu0 %248 }
  0x94   :  { %1641 = vpow2.f32 %v1091_v45  ;;  %v243_v60 = vpop.permute.xlu1 %242  ;;  %v251_v0 = vmul.f32 %v249_v61, %v1837_v62 }
  0x95   :  { %1643 = vrcp.f32 %v96_v46  ;;  %v245_v63 = vmul.f32 %v243_v60, %v14_v23  ;;  %v326_v60 = vrot.slane %v1837_v62, %v1823_v22 }
  0x96   :  { %v1638_v47 = vpop.eup %1637 }
  0x97   :  { %v97_v48 = vadd.f32 1.0, %v1638_v47  ;;  %v252_v1 = vadd.f32 %v251_v0, %v245_v63 }
  0x98   :  { %v256_v6 = vpop.permute.xlu1 %255  ;;  %v110_v5 = vpop.permute.xlu0 %109 }
  0x99   :  { %1645 = vrcp.f32 %v97_v48  ;;  %v258_v8 = vadd.f32 %v256_v6, %v252_v1 }
  0x9b   :  { %v1097_v10 = vmul.f32 -1.442695, %v258_v8 }
  0x9d   :  { %v1640_v49 = vpop.eup %1639  ;;  %v115_v13 = vpop.permute.xlu1 %114 }
  0x9e   :  { %v1642_v50 = vpop.eup %1641  ;;  %v98_v51 = vadd.f32 1.0, %v1640_v49  ;;  %v237_v34 = vpop.permute.xlu0 %236 }
  0x9f   :  { %v99_v52 = vadd.f32 1.0, %v1642_v50  ;;  %v1644_v53 = vpop.eup %1643 }
  0xa0   :  { %1647 = vrcp.f32 %v98_v51 }
  0xa1   :  { %1649 = vrcp.f32 %v99_v52 }
  0xa2   :  { %1651 = vpow2.f32 %v1097_v10  ;;  %v221_v15 = vpop.permute.xlu1 %220  ;;  %v305_v37 = vpop.permute.xlu0 %304 }
  0xa3   :  { %v1646_v54 = vpop.eup %1645  ;;  %v327_v11 = vmul.f32 %v326_v60, %v305_v37 }
  0xa4   :  { %v1468_v55 = vpack.c.bf16 %v1646_v54, %v1644_v53 }
  0xa6   :  { %1469 = vmatprep.subr.bf16.mxu0 %v1468_v55  ;;  %v217_v17 = vpop.permute.xlu1 %216 }
  0xa7   :  { %1471 = vmatpush3.bf16.msra.mxu0 %v1468_v55  ;;  %v287_v44 = vpop.permute.xlu0 %286 }
  0xaa   :  { %v1648_v56 = vpop.eup %1647 }
  0xab   :  { %v1650_v57 = vpop.eup %1649  ;;  %v274_v19 = vpop.permute.xlu1 %273 }
  0xac   :  { %v1472_v58 = vpack.c.bf16 %v1650_v57, %v1648_v56  ;;  %v1652_v14 = vpop.eup %1651  ;;  %v339_v50 = vpop.permute.xlu0 %338 }
  0xad   :  { %v262_v16 = vadd.f32 1.0, %v1652_v14 }
  0xae   :  { %1474 = vmatprep.subr.msk.bf16.mxu0 %vm1473_vm3, %v1472_v58 }
  0xaf   :  { %1477 = vmatpush3.bf16.msk.msra.mxu0 %vm1473_vm3, %v1472_v58  ;;  %1653 = vrcp.f32 %v262_v16  ;;  %v278_v4 = vpop.permute.xlu1 %277  ;;  %v17_v58 = vld [vmem:[%s2185_s0 + $0x3] sm:$0x1] }
  0xb0   :  { %v351_v57 = vpop.permute.xlu0 %350 }
  0xb2   :  { %1307 = vmatmul.mubr.msk.f32.vlgmr.msra.gmra.mrb[0].mxu0 %vm117_vm0, %v31_v59 }
  0xb4   :  { %v309_v29 = vpop.permute.xlu1 %308 }
  0xb5   :  { %v321_v6 = vpop.permute.xlu0 %320  ;;  %v328_v7 = vmul.f32 %v326_v60, %v309_v29 }
  0xb9   :  { %v1654_v27 = vpop.eup %1653  ;;  %v282_v33 = vpop.permute.xlu1 %281 }
  0xba   :  { %v265_v28 = vmul.f32 1.442695, %v1654_v27 }
  0xbe   :  { %v313_v36 = vpop.permute.xlu1 %312 }
  0xbf   :  { %v329_v10 = vmul.f32 %v326_v60, %v313_v36 }
  0xc2   :  { %v317_v43 = vpop.permute.xlu1 %316 }
  0xc3   :  { %v330_v12 = vmul.f32 %v326_v60, %v317_v43 }
  0xc7   :  { %v343_v49 = vpop.permute.xlu1 %342 }
  0xcb   :  { %v347_v56 = vpop.permute.xlu1 %346 }
  0xd0   :  { %v292_v1 = vpop.permute.xlu1 %291 }
 0x185   :  { %v1308_v18 = vpop.f32.mrb[0].mxu0 }
 0x186   :  { %v200_v23 = vadd.f32 %v1308_v18, %v115_v13  ;;  %v194_v24 = vpop.f32.mrb[1].mxu0  ;;  %v331_v13 = vmul.f32 %v326_v60, %v321_v6  ;;  %v1729_v60 = vmov 1.0|1.0   ;;  %v1920_v6 = vadd.s32 40, %v1820_v21 }
 0x187   :  { %v195_v3 = vadd.f32 %v194_v24, %v110_v5  ;;  %v355_v24 = vpop.permute.xlu1 %354 }
 0x188   :  { %v1096_v25 = vmul.f32 -1.442695, %v200_v23 }
 0x189   :  { %v1095_v26 = vmul.f32 -1.442695, %v195_v3 }
 0x18a   :  { %1655 = vpow2.f32 %v1096_v25 }
 0x18b   :  { %1657 = vpow2.f32 %v1095_v26 }
 0x18c   :  { %1659 = vpow2.f32 %v265_v28 }
 0x194   :  { %v1656_v30 = vpop.eup %1655 }
 0x195   :  { %v1658_v31 = vpop.eup %1657  ;;  %v210_v32 = vadd.f32 1.0, %v1656_v30 }
 0x196   :  { %v209_v9 = vadd.f32 1.0, %v1658_v31  ;;  %v1660_v35 = vpop.eup %1659 }
 0x197   :  { %1661 = vrcp.f32 %v210_v32  ;;  %v267_v38 = vadd.f32 1.0, %v1660_v35 }
 0x198   :  { %1663 = vrcp.f32 %v209_v9 }
 0x199   :  { %1665 = vlog2.f32 %v267_v38 }
 0x1a1   :  { %v1662_v39 = vpop.eup %1661 }
 0x1a2   :  { %v1664_v40 = vpop.eup %1663  ;;  %v224_v41 = vmul.f32 %v1662_v39, %v221_v15 }
 0x1a3   :  { %v223_v42 = vmul.f32 %v1664_v40, %v217_v17  ;;  %v1666_v52 = vpop.eup %1665 }
 0x1a4   :  { %v226_v45 = vsel %vm225_vm5, %v224_v41, 0.0  ;;  %v269_v55 = vmul.f32 0.6931472, %v1666_v52  ;;  %v1728_v52 = vmov 0.0|0.0  }
 0x1a5   :  { %v227_v46 = vadd.f32 %v226_v45, %v223_v42  ;;  %1486 = vmatprep.subr.bf16.mxu0 %v1728_v52 }
 0x1a6   :  { %v270_v63 = vmul.f32 %v269_v55, %v17_v58  ;;  %v591_v55 = vand.u32 3, %v1820_v21  ;;  %v1893_v58 = vadd.s32 16, %v1820_v21 }
 0x1a7   :  { %v228_v47 = vrot.slane %v227_v46, 4 }
 0x1a9   :  { %v229_v48 = vadd.f32 %v228_v47, %v227_v46 }
 0x1ab   :  { %v230_v51 = vrot.slane %v229_v48, 2 }
 0x1ad   :  { %v231_v53 = vadd.f32 %v230_v51, %v229_v48  ;;  %v35_v51 = vld [vmem:[%s2184_s2 + $0x50] sm:$0x1] }
 0x1af   :  { %v232_v54 = vrot.slane %v231_v53, 1 }
 0x1b1   :  { %v233_v59 = vadd.f32 %v232_v54, %v231_v53  ;;  %v1880_v53 = vadd.s32 8, %v1820_v21  ;;  %v1883_v54 = vand.u32 127, %v56_v20  ;;  %v754_v20 = vld [vmem:[%s2186_s1] sm:$0xff] }
 0x1b3   :  { %v239_v61 = vadd.f32 %v237_v34, %v233_v59  ;;  %v1896_v59 = vadd.s32 24, %v1820_v21 }
 0x1b5   :  { %v1862_v0 = vadd.f32 %v270_v63, %v239_v61  ;;  %v593_v61 = vand.u32 3, %v1893_v58  ;;  %v594_v63 = vand.u32 3, %v1896_v59 }
 0x1b7   :  { %v297_v8 = vrot.slane %v1862_v0, %v1823_v22 }
 0x1b9   :  { %v301_v14 = vmul.f32 %v297_v8, %v287_v44  ;;  %v299_v15 = vmul.f32 %v297_v8, %v278_v4  ;;  %v298_v16 = vmul.f32 %v297_v8, %v274_v19  ;;  %v300_v17 = vmul.f32 %v297_v8, %v282_v33 }
 0x1ba   :  { %v302_v2 = vmul.f32 %v297_v8, %v292_v1  ;;  %v1917_v1 = vadd.s32 32, %v1820_v21 }
 0x1bb   :  { %v333_v62 = vadd.f32 %v328_v7, %v299_v15  ;;  %v332_v5 = vadd.f32 %v327_v11, %v298_v16  ;;  %v334_v18 = vadd.f32 %v329_v10, %v300_v17  ;;  %v335_v23 = vadd.f32 %v330_v12, %v301_v14 }
 0x1bc   :  { %v336_v3 = vadd.f32 %v331_v13, %v302_v2  ;;  %v595_v8 = vand.u32 3, %v1917_v1  ;;  %v596_v10 = vand.u32 3, %v1920_v6  ;;  %v1941_v11 = vadd.s32 48, %v1820_v21 }
 0x1bd   :  { %v358_v25 = vadd.f32 %v343_v49, %v333_v62  ;;  %v357_v26 = vadd.f32 %v339_v50, %v332_v5  ;;  %v359_v27 = vadd.f32 %v347_v56, %v334_v18  ;;  %v360_v28 = vadd.f32 %v351_v57, %v335_v23  ;;  %v33_v49 = vld [vmem:[%s2184_s2 + $0x40] sm:$0xff]  ;;  %v34_v50 = vld [vmem:[%s2184_s2 + $0x48] sm:$0xff] }
 0x1be   :  { %v361_v29 = vadd.f32 %v355_v24, %v336_v3  ;;  %v592_v56 = vand.u32 3, %v1880_v53  ;;  %v1888_v57 = vand.u32 3, %v1883_v54  ;;  %v1944_v12 = vadd.s32 56, %v1820_v21 }
 0x1bf   :  { %v1099_v30 = vmul.f32 -1.442695, %v358_v25  ;;  %v1098_v31 = vmul.f32 -1.442695, %v357_v26  ;;  %v1100_v32 = vmul.f32 -1.442695, %v359_v27 }
 0x1c0   :  { %v1101_v9 = vmul.f32 -1.442695, %v360_v28  ;;  %v1102_v19 = vmul.f32 -1.442695, %v361_v29  ;;  %vm608_vm6 = vcmp.eq.s32.totalorder %v591_v55, %v1888_v57  ;;  %vm609_vm7 = vcmp.eq.s32.totalorder %v592_v56, %v1888_v57 }
 0x1c1   :  { %1667 = vpow2.f32 %v1099_v30  ;;  %vm1898_vm8 = vmpackc.low %vm609_vm7, %vm608_vm6  ;;  %vm610_vm9 = vcmp.eq.s32.totalorder %v593_v61, %v1888_v57  ;;  %vm611_vm10 = vcmp.eq.s32.totalorder %v594_v63, %v1888_v57  ;;  %vm612_vm12 = vcmp.eq.s32.totalorder %v595_v8, %v1888_v57 }
 0x1c2   :  { %1669 = vpow2.f32 %v1098_v31  ;;  %1488 = vmatpush3.bf16.msk.msra.mxu0 %vm1898_vm8, %v1729_v60  ;;  %vm1922_vm11 = vmpackc.low %vm611_vm10, %vm610_vm9  ;;  %vm613_vm13 = vcmp.eq.s32.totalorder %v596_v10, %v1888_v57  ;;  %v597_v14 = vand.u32 3, %v1941_v11  ;;  %v598_v15 = vand.u32 3, %v1944_v12 }
 0x1c3   :  { %1671 = vpow2.f32 %v1100_v32  ;;  %1489 = vmatprep.subr.bf16.mxu0 %v1728_v52  ;;  %vm1946_vm14 = vmpackc.low %vm613_vm13, %vm612_vm12  ;;  %v1965_v16 = vadd.s32 64, %v1820_v21  ;;  %v1968_v17 = vadd.s32 72, %v1820_v21  ;;  %v1989_v18 = vadd.s32 80, %v1820_v21 }
 0x1c4   :  { %1673 = vpow2.f32 %v1101_v9  ;;  %vm614_vm15 = vcmp.eq.s32.totalorder %v597_v14, %v1888_v57  ;;  %vm615_vm0 = vcmp.eq.s32.totalorder %v598_v15, %v1888_v57  ;;  %v1992_v23 = vadd.s32 88, %v1820_v21 }
 0x1c5   :  { %1675 = vpow2.f32 %v1102_v19  ;;  %vm1970_vm2 = vmpackc.low %vm615_vm0, %vm614_vm15  ;;  %v599_v62 = vand.u32 3, %v1965_v16  ;;  %v600_v5 = vand.u32 3, %v1968_v17  ;;  %v1999_v3 = vadd.s32 96, %v1820_v21 }
 0x1c6   :  { %1491 = vmatpush3.bf16.msk.msra.mxu0 %vm1922_vm11, %v1729_v60  ;;  %v2002_v25 = vadd.s32 104, %v1820_v21  ;;  %v2005_v26 = vadd.s32 112, %v1820_v21  ;;  %v2008_v27 = vadd.s32 120, %v1820_v21  ;;  %v601_v28 = vand.u32 3, %v1989_v18 }
 0x1c7   :  { %1492 = vmatprep.subr.bf16.mxu0 %v1728_v52  ;;  %vm616_vm3 = vcmp.eq.s32.totalorder %v599_v62, %v1888_v57  ;;  %v602_v29 = vand.u32 3, %v1992_v23  ;;  %v603_v30 = vand.u32 3, %v1999_v3  ;;  %vm1730_vm6 = vmmov 0  }
 0x1c8   :  { %v604_v31 = vand.u32 3, %v2002_v25  ;;  %v1731_v32 = vmov 0.0   ;;  %vm618_vm7 = vcmp.eq.s32.totalorder %v601_v28, %v1888_v57  ;;  %v605_v9 = vand.u32 3, %v2005_v26 }
 0x1c9   :  { %1357 = vmatprep.mubr.msk.f32.mxu0 %vm1730_vm6, %v1731_v32  ;;  %vm619_vm9 = vcmp.eq.s32.totalorder %v602_v29, %v1888_v57  ;;  %v606_v19 = vand.u32 3, %v2008_v27  ;;  %vm620_vm12 = vcmp.eq.s32.totalorder %v603_v30, %v1888_v57 }
 0x1ca   :  { %1494 = vmatpush3.bf16.msk.msra.mxu0 %vm1946_vm14, %v1729_v60  ;;  %vm2030_vm10 = vmpackc.low %vm619_vm9, %vm618_vm7  ;;  %vm621_vm13 = vcmp.eq.s32.totalorder %v604_v31, %v1888_v57  ;;  %vm622_vm0 = vcmp.eq.s32.totalorder %v605_v9, %v1888_v57 }
 0x1cb   :  { %v1668_v4 = vpop.eup %1667  ;;  %1495 = vmatprep.subr.bf16.mxu0 %v1728_v52  ;;  %vm2043_vm15 = vmpackc.low %vm621_vm13, %vm620_vm12 }
 0x1cc   :  { %v1670_v33 = vpop.eup %1669  ;;  %v378_v34 = vadd.f32 1.0, %v1668_v4  ;;  %v756_v4 = vld [vmem:[%s2186_s1 + $0x10] sm:$0xff] }
 0x1cd   :  { %v1672_v35 = vpop.eup %1671  ;;  %v377_v36 = vadd.f32 1.0, %v1670_v33 }
 0x1ce   :  { %v1674_v37 = vpop.eup %1673  ;;  %1677 = vrcp.f32 %v378_v34  ;;  %v379_v38 = vadd.f32 1.0, %v1672_v35  ;;  %1497 = vmatpush3.bf16.msk.msra.mxu0 %vm1970_vm2, %v1729_v60  ;;  %v394_v35 = vpop.permute.xlu1 %393 }
 0x1cf   :  { %1679 = vrcp.f32 %v377_v36  ;;  %v380_v39 = vadd.f32 1.0, %v1674_v37  ;;  %v1676_v40 = vpop.eup %1675  ;;  %1498 = vmatprep.subr.bf16.mxu0 %v1728_v52  ;;  %v398_v37 = vpop.permute.xlu0 %397 }
 0x1d0   :  { %1681 = vrcp.f32 %v379_v38  ;;  %v381_v41 = vadd.f32 1.0, %v1676_v40 }
 0x1d1   :  { %1683 = vrcp.f32 %v380_v39 }
 0x1d2   :  { %1685 = vrcp.f32 %v381_v41  ;;  %v402_v36 = vpop.permute.xlu1 %401 }
 0x1d3   :  { %v532_v15 = vpop.permute.xlu0 %531 }
 0x1d8   :  { %v1678_v42 = vpop.eup %1677 }
 0x1d9   :  { %v1680_v43 = vpop.eup %1679 }
 0x1da   :  { %v1682_v44 = vpop.eup %1681  ;;  %v1478_v45 = vpack.c.bf16 %v1678_v42, %v1680_v43  ;;  %v406_v43 = vpop.permute.xlu1 %405 }
 0x1db   :  { %v1684_v46 = vpop.eup %1683 }
 0x1dc   :  { %1479 = vmatprep.subr.bf16.mxu1 %v1478_v45  ;;  %v1482_v47 = vpack.c.bf16 %v1684_v46, %v1682_v44  ;;  %v1686_v48 = vpop.eup %1685 }
 0x1dd   :  { %1481 = vmatpush3.bf16.msra.mxu1 %v1478_v45 }
 0x1de   :  { %1483 = vmatprep.subr.bf16.mxu1 %v1482_v47  ;;  %v536_v62 = vpop.permute.xlu1 %535 }
 0x1e1   :  { %1485 = vmatpush3.bf16.msra.mxu1 %v1482_v47 }
 0x1e2   :  { %1317 = vmatprep.subr.mxu1 %v1686_v48 }
 0x1e5   :  { %1318 = vmatpush3.msra.mxu1 %v1686_v48 }
 0x1e6   :  { %1320 = vmatmul.mubr.msk.f32.vlgmr.msra.gmra.mrb[0].mxu1 %vm408_vm4, %v33_v49  ;;  %1511 = vmatprep.subr.msk.bf16.mxu1 %vm1898_vm8, %v1729_v60 }
 0x1e7   :  { %1322 = vmatprep.mubr.msk.f32.mxu1 %vm408_vm4, %v34_v50  ;;  %1513 = vmatpush3.bf16.msk.msra.mxu1 %vm1898_vm8, %v1729_v60 }
 0x1e8   :  { %1515 = vmatprep.subr.msk.bf16.mxu1 %vm1922_vm11, %v1729_v60 }
 0x1ea   :  { %1323 = vmatmul.mubr.msk.f32.gmra.mrb[2].mxu1 %vm408_vm4, %v35_v51  ;;  %vm617_vm4 = vcmp.eq.s32.totalorder %v600_v5, %v1888_v57 }
 0x1eb   :  { %1517 = vmatpush3.bf16.msk.msra.mxu1 %vm1922_vm11, %v1729_v60  ;;  %vm1994_vm5 = vmpackc.low %vm617_vm4, %vm616_vm3  ;;  %vm623_vm3 = vcmp.eq.s32.totalorder %v606_v19, %v1888_v57  ;;  %v544_v19 = vpop.permute.xlu0 %543 }
 0x1ec   :  { %1519 = vmatprep.subr.msk.bf16.mxu1 %vm1946_vm14, %v1729_v60  ;;  %1500 = vmatpush3.bf16.msk.msra.mxu0 %vm1994_vm5, %v1729_v60  ;;  %vm2059_vm4 = vmpackc.low %vm623_vm3, %vm622_vm0 }
 0x1ed   :  { %1501 = vmatprep.subr.bf16.mxu0 %v1728_v52 }
 0x1ef   :  { %1521 = vmatpush3.bf16.msk.msra.mxu1 %vm1946_vm14, %v1729_v60 }
 0x1f0   :  { %1523 = vmatprep.subr.msk.bf16.mxu1 %vm1970_vm2, %v1729_v60  ;;  %1503 = vmatpush3.bf16.msk.msra.mxu0 %vm2030_vm10, %v1729_v60 }
 0x1f1   :  { %1504 = vmatprep.subr.bf16.mxu0 %v1728_v52 }
 0x1f3   :  { %1525 = vmatpush3.bf16.msk.msra.mxu1 %vm1970_vm2, %v1729_v60 }
 0x1f4   :  { %1527 = vmatprep.subr.msk.bf16.mxu1 %vm1994_vm5, %v1729_v60  ;;  %1506 = vmatpush3.bf16.msk.msra.mxu0 %vm2043_vm15, %v1729_v60 }
 0x1f5   :  { %1507 = vmatprep.subr.bf16.mxu0 %v1728_v52 }
 0x1f7   :  { %1529 = vmatpush3.bf16.msk.msra.mxu1 %vm1994_vm5, %v1729_v60 }
 0x1f8   :  { %1531 = vmatprep.subr.msk.bf16.mxu1 %vm2030_vm10, %v1729_v60  ;;  %1509 = vmatpush3.bf16.msk.msra.mxu0 %vm2059_vm4, %v1729_v60 }
 0x1f9   :  { %1542 = vmatprep.subr.bf16.mxu0 %v1728_v52 }
 0x1fb   :  { %1533 = vmatpush3.bf16.msk.msra.mxu1 %vm2030_vm10, %v1729_v60 }
 0x1fc   :  { %1535 = vmatprep.subr.msk.bf16.mxu1 %vm2043_vm15, %v1729_v60 }
 0x1ff   :  { %1537 = vmatpush3.bf16.msk.msra.mxu1 %vm2043_vm15, %v1729_v60 }
 0x200   :  { %1539 = vmatprep.subr.msk.bf16.mxu1 %vm2059_vm4, %v1729_v60 }
 0x203   :  { %1541 = vmatpush3.bf16.msk.msra.mxu1 %vm2059_vm4, %v1729_v60 }
 0x204   :  { %1566 = vmatprep.subr.bf16.mxu1 %v1728_v52 }
 0x2b9   :  { %v1321_v38 = vpop.f32.mrb[0].mxu1 }
 0x2ba   :  { %v493_v39 = vadd.f32 %v1321_v38, %v398_v37  ;;  %v487_v40 = vpop.f32.mrb[1].mxu1 }
 0x2bb   :  { %v488_v41 = vadd.f32 %v487_v40, %v394_v35 }
 0x2bc   :  { %v1108_v42 = vmul.f32 -1.442695, %v493_v39 }
 0x2bd   :  { %v1107_v44 = vmul.f32 -1.442695, %v488_v41  ;;  %v1324_v45 = vpop.f32.mrb[2].mxu1 }
 0x2be   :  { %1687 = vpow2.f32 %v1108_v42  ;;  %v503_v46 = vadd.f32 %v1324_v45, %v406_v43  ;;  %v497_v47 = vpop.f32.mrb[3].mxu1 }
 0x2bf   :  { %1689 = vpow2.f32 %v1107_v44  ;;  %v498_v48 = vadd.f32 %v497_v47, %v402_v36  ;;  %v540_v36 = vpop.permute.xlu1 %539 }
 0x2c0   :  { %v1110_v49 = vmul.f32 -1.442695, %v503_v46 }
 0x2c1   :  { %v1109_v50 = vmul.f32 -1.442695, %v498_v48 }
 0x2c2   :  { %1691 = vpow2.f32 %v1110_v49 }
 0x2c3   :  { %1693 = vpow2.f32 %v1109_v50  ;;  %v563_v47 = vpop.permute.xlu1 %562 }
 0x2c8   :  { %v1688_v51 = vpop.eup %1687 }
 0x2c9   :  { %v1690_v55 = vpop.eup %1689  ;;  %v519_v56 = vadd.f32 1.0, %v1688_v51 }
 0x2ca   :  { %v518_v61 = vadd.f32 1.0, %v1690_v55 }
 0x2cb   :  { %1695 = vrcp.f32 %v519_v56  ;;  %v16_v56 = vld [vmem:[%s2185_s0 + $0x2] sm:$0x1] }
 0x2cc   :  { %v1692_v63 = vpop.eup %1691  ;;  %1697 = vrcp.f32 %v518_v61 }
 0x2cd   :  { %v1694_v8 = vpop.eup %1693  ;;  %v521_v10 = vadd.f32 1.0, %v1692_v63 }
 0x2ce   :  { %v520_v14 = vadd.f32 1.0, %v1694_v8 }
 0x2cf   :  { %1699 = vrcp.f32 %v521_v10 }
 0x2d0   :  { %1701 = vrcp.f32 %v520_v14 }
 0x2d5   :  { %v1696_v5 = vpop.eup %1695 }
 0x2d6   :  { %v1698_v28 = vpop.eup %1697  ;;  %v547_v29 = vmul.f32 %v1696_v5, %v536_v62 }
 0x2d7   :  { %v546_v30 = vmul.f32 %v1698_v28, %v532_v15  ;;  %v733_v28 = vshra.s32 %v1883_v54, 2 }
 0x2d9   :  { %v1700_v31 = vpop.eup %1699  ;;  %v550_v9 = vadd.f32 %v547_v29, %v546_v30  ;;  %vm734_vm7 = vcmp.eq.s32.totalorder %v733_v28, %v1820_v21  ;;  %vm735_vm9 = vcmp.eq.s32.totalorder %v733_v28, %v1880_v53  ;;  %vm736_vm12 = vcmp.eq.s32.totalorder %v733_v28, %v1893_v58 }
 0x2da   :  { %v1702_v35 = vpop.eup %1701  ;;  %v549_v37 = vmul.f32 %v1700_v31, %v544_v19  ;;  %v1144_v31 = vsel %vm734_vm7, 1.0, %v1731_v32  ;;  %vm737_vm13 = vcmp.eq.s32.totalorder %v733_v28, %v1896_v59 }
 0x2db   :  { %v548_v38 = vmul.f32 %v1702_v35, %v540_v36  ;;  %v1146_v35 = vsel %vm736_vm12, 1.0, %v1731_v32 }
 0x2dc   :  { %v552_v40 = vsel %vm124_vm1, %v549_v37, 0.0 }
 0x2dd   :  { %v551_v39 = vadd.f32 %v550_v9, %v548_v38  ;;  %v1145_v9 = vsel %vm735_vm9, 1.0, %v1731_v32  ;;  %v1147_v38 = vsel %vm737_vm13, 1.0, %v1731_v32 }
 0x2df   :  { %v553_v41 = vadd.f32 %v552_v40, %v551_v39 }
 0x2e1   :  { %v554_v42 = vrot.slane %v553_v41, 4 }
 0x2e3   :  { %v555_v43 = vadd.f32 %v554_v42, %v553_v41 }
 0x2e5   :  { %v556_v44 = vrot.slane %v555_v43, 2 }
 0x2e7   :  { %v557_v45 = vadd.f32 %v556_v44, %v555_v43 }
 0x2e9   :  { %v558_v46 = vrot.slane %v557_v45, 1 }
 0x2eb   :  { %v559_v48 = vadd.f32 %v558_v46, %v557_v45 }
 0x2ed   :  { %v565_v49 = vadd.f32 %v563_v47, %v559_v48 }
 0x2ef   :  { %v1111_v50 = vmul.f32 -1.442695, %v565_v49 }
 0x2f1   :  { %1703 = vpow2.f32 %v1111_v50  ;;  %v852_v50 = vcvt.s32.f32 %v1820_v21 }
 0x2fb   :  { %v1704_v51 = vpop.eup %1703 }
 0x2fc   :  { %v569_v55 = vadd.f32 1.0, %v1704_v51  ;;  %v853_v51 = vcvt.s32.f32 %v1880_v53 }
 0x2fe   :  { %1705 = vrcp.f32 %v569_v55  ;;  %v854_v55 = vcvt.s32.f32 %v1893_v58 }
 0x308   :  { %v1706_v61 = vpop.eup %1705 }
 0x309   :  { %v656_v63 = vmul.f32 %v1706_v61, %v16_v56  ;;  %v855_v56 = vcvt.s32.f32 %v1896_v59 }
 0x30b   :  { %1358 = vmatmul.mubr.f32.vlgmr.msra.gmra.mrb[2].mxu0 %v656_v63 }
 0x30c   :  { %1430 = vmatprep.mubr.msk.f32.mxu0 %vm1730_vm6, %v1731_v32 }
 0x3de   :  { %v723_v8 = vpop.f32.mrb[2].mxu0 }
 0x3df   :  { %1707 = vrcp.f32 %v723_v8  ;;  %v1359_v10 = vpop.f32.mrb[3].mxu0 }
 0x3e9   :  { %v1708_v14 = vpop.eup %1707 }
 0x3ea   :  { %v2083_v15 = vmul.f32 %v1708_v14, %v656_v63 }
 0x3ec   :  { %v729_v62 = vmul.f32 0.1, %v2083_v15 }
 0x3ee   :  { %v730_v5 = vadd.f32 0.028125, %v729_v62 }
 0x3f0   :  { %1709 = vlog2.f32 %v730_v5 }
 0x3fa   :  { %v1710_v29 = vpop.eup %1709 }
 0x3fb   :  { %v732_v30 = vmul.f32 0.6931472, %v1710_v29 }
 0x3fd   :  { %v749_v19 = vrot.slane %v732_v30, %v1823_v22  ;;  %v755_v22 = vld [vmem:[%s2186_s1 + $0x8] sm:$0xff] }
 0x3ff   :  { %v750_v36 = vmul.f32 %v1144_v31, %v749_v19  ;;  %v751_v54 = vmul.f32 %v1145_v9, %v749_v19  ;;  %v752_v37 = vmul.f32 %v1146_v35, %v749_v19  ;;  %v753_v39 = vmul.f32 %v1147_v38, %v749_v19 }
 0x401   :  { %1392 = vmatprep.mubr.f32.mxu1 %v750_v36 }
 0x402   :  { %1393 = vmatmul.mubr.f32.vlgmr.msra.gmra.mrb[4].mxu1 %v751_v54 }
 0x403   :  { %1395 = vmatprep.mubr.f32.mxu1 %v752_v37  ;;  %1568 = vmatpush3.bf16.msk.msra.mxu1 %vm1898_vm8, %v1729_v60 }
 0x404   :  { %1569 = vmatprep.subr.bf16.mxu1 %v1728_v52 }
 0x406   :  { %1396 = vmatmul.mubr.f32.gmra.mrb[6].mxu1 %v753_v39 }
 0x407   :  { %1571 = vmatpush3.bf16.msk.msra.mxu1 %vm1922_vm11, %v1729_v60  ;;  %1465 = vmatprep.mubr.msk.f32.mxu1 %vm1730_vm6, %v1731_v32  ;;  %v757_v32 = vld [vmem:[%s2186_s1 + $0x18] sm:$0xff] }
 0x408   :  { %1572 = vmatprep.subr.bf16.mxu1 %v1728_v52 }
 0x40b   :  { %1574 = vmatpush3.bf16.msk.msra.mxu1 %vm1946_vm14, %v1729_v60 }
 0x40c   :  { %1575 = vmatprep.subr.bf16.mxu1 %v1728_v52 }
 0x40f   :  { %1577 = vmatpush3.bf16.msk.msra.mxu1 %vm1970_vm2, %v1729_v60 }
 0x410   :  { %1578 = vmatprep.subr.bf16.mxu1 %v1728_v52 }
 0x413   :  { %1580 = vmatpush3.bf16.msk.msra.mxu1 %vm1994_vm5, %v1729_v60 }
 0x414   :  { %1581 = vmatprep.subr.bf16.mxu1 %v1728_v52 }
 0x417   :  { %1583 = vmatpush3.bf16.msk.msra.mxu1 %vm2030_vm10, %v1729_v60 }
 0x418   :  { %1584 = vmatprep.subr.bf16.mxu1 %v1728_v52 }
 0x41b   :  { %1586 = vmatpush3.bf16.msk.msra.mxu1 %vm2043_vm15, %v1729_v60 }
 0x41c   :  { %1587 = vmatprep.subr.bf16.mxu1 %v1728_v52 }
 0x41f   :  { %1589 = vmatpush3.bf16.msk.msra.mxu1 %vm2059_vm4, %v1729_v60 }
 0x4d5   :  { %v1394_v7 = vpop.f32.mrb[4].mxu1 }
 0x4d6   :  { %v830_v13 = vadd.f32 %v1394_v7, %v755_v22  ;;  %v824_v2 = vpop.f32.mrb[5].mxu1 }
 0x4d7   :  { %v825_v24 = vadd.f32 %v824_v2, %v754_v20 }
 0x4d9   :  { %v843_v33 = vmax.f32 %v825_v24, %v830_v13  ;;  %v1397_v34 = vpop.f32.mrb[6].mxu1 }
 0x4da   :  { %v840_v40 = vadd.f32 %v1397_v34, %v757_v32  ;;  %v834_v41 = vpop.f32.mrb[7].mxu1 }
 0x4db   :  { %v835_v42 = vadd.f32 %v834_v41, %v756_v4 }
 0x4dd   :  { %v844_v43 = vmax.f32 %v835_v42, %v840_v40 }
 0x4df   :  { %v845_v44 = vmax.f32 %v843_v33, %v844_v43 }
 0x4e1   :  { %v846_v45 = vrot.slane %v845_v44, 4 }
 0x4e3   :  { %v847_v46 = vmax.f32 %v845_v44, %v846_v45 }
 0x4e5   :  { %v848_v47 = vrot.slane %v847_v46, 2 }
 0x4e7   :  { %v849_v48 = vmax.f32 %v847_v46, %v848_v47 }
 0x4e9   :  { %v850_v49 = vrot.slane %v849_v48, 1 }
 0x4eb   :  { %v851_v61 = vmax.f32 %v849_v48, %v850_v49 }
 0x4ed   :  { %vm856_vm8 = vcmp.ge.f32.partialorder %v825_v24, %v851_v61  ;;  %vm857_vm11 = vcmp.ge.f32.partialorder %v830_v13, %v851_v61  ;;  %vm858_vm14 = vcmp.ge.f32.partialorder %v835_v42, %v851_v61  ;;  %vm859_vm2 = vcmp.ge.f32.partialorder %v840_v40, %v851_v61 }
 0x4ee   :  { %v860_v63 = vsel %vm856_vm8, %v852_v50, 32.0  ;;  %v861_v8 = vsel %vm857_vm11, %v853_v51, 32.0  ;;  %v862_v10 = vsel %vm858_vm14, %v854_v55, 32.0  ;;  %v863_v14 = vsel %vm859_vm2, %v855_v56, 32.0 }
 0x4ef   :  { %v864_v62 = vmin.f32 %v860_v63, %v861_v8  ;;  %v865_v5 = vmin.f32 %v862_v10, %v863_v14 }
 0x4f1   :  { %v866_v28 = vmin.f32 %v864_v62, %v865_v5 }
 0x4f3   :  { %v867_v29 = vrot.slane %v866_v28, 4 }
 0x4f5   :  { %v868_v30 = vmin.f32 %v866_v28, %v867_v29 }
 0x4f7   :  { %v869_v31 = vrot.slane %v868_v30, 2 }
 0x4f9   :  { %v870_v9 = vmin.f32 %v868_v30, %v869_v31 }
 0x4fb   :  { %v871_v19 = vrot.slane %v870_v9, 1 }
 0x4fd   :  { %v872_v35 = vmin.f32 %v870_v9, %v871_v19 }
 0x4ff   :  { %v1590_v36 = vtrunc.f32 %v872_v35 }
 0x501   :  { %v1591_v54 = vcvt.f32.s32 %v1590_v36 }
 0x503   :  { %v874_v37 = vmul.u32 4, %v1591_v54 }
 0x505   :  { %v875_v38 = vadd.s32 %v874_v37, %v1888_v57 }
 0x507   :  { %vm876_vm5 = vcmp.eq.s32.totalorder %v1820_v21, %v875_v38  ;;  %vm877_vm6 = vcmp.eq.s32.totalorder %v1880_v53, %v875_v38  ;;  %vm878_vm15 = vcmp.eq.s32.totalorder %v1893_v58, %v875_v38  ;;  %vm879_vm0 = vcmp.eq.s32.totalorder %v1896_v59, %v875_v38 }
 0x508   :  { %vm1543_vm10 = vmpackc.low %vm877_vm6, %vm876_vm5  ;;  %vm880_vm4 = vcmp.eq.s32.totalorder %v1917_v1, %v875_v38  ;;  %vm881_vm7 = vcmp.eq.s32.totalorder %v1920_v6, %v875_v38  ;;  %vm882_vm12 = vcmp.eq.s32.totalorder %v1941_v11, %v875_v38  ;;  %vm883_vm13 = vcmp.eq.s32.totalorder %v1944_v12, %v875_v38 }
 0x509   :  { %1544 = vmatpush3.bf16.msk.msra.mxu0 %vm1543_vm10, %v1729_v60  ;;  %vm1546_vm3 = vmpackc.low %vm879_vm0, %vm878_vm15  ;;  %vm884_vm11 = vcmp.eq.s32.totalorder %v1965_v16, %v875_v38  ;;  %vm885_vm14 = vcmp.eq.s32.totalorder %v1968_v17, %v875_v38  ;;  %vm886_vm5 = vcmp.eq.s32.totalorder %v1989_v18, %v875_v38  ;;  %vm887_vm6 = vcmp.eq.s32.totalorder %v1992_v23, %v875_v38 }
 0x50a   :  { %1545 = vmatprep.subr.bf16.mxu0 %v1728_v52  ;;  %vm1549_vm9 = vmpackc.low %vm881_vm7, %vm880_vm4  ;;  %vm888_vm15 = vcmp.eq.s32.totalorder %v1999_v3, %v875_v38  ;;  %vm889_vm0 = vcmp.eq.s32.totalorder %v2002_v25, %v875_v38  ;;  %vm890_vm4 = vcmp.eq.s32.totalorder %v2005_v26, %v875_v38  ;;  %vm891_vm7 = vcmp.eq.s32.totalorder %v2008_v27, %v875_v38 }
 0x50b   :  { %vm1552_vm8 = vmpackc.low %vm883_vm13, %vm882_vm12  ;;  %v925_v21 = vrot.slane %v2083_v15, 7 }
 0x50c   :  { %vm1555_vm2 = vmpackc.low %vm885_vm14, %vm884_vm11 }
 0x50d   :  { %1547 = vmatpush3.bf16.msk.msra.mxu0 %vm1546_vm3, %v1729_v60  ;;  %vm1558_vm10 = vmpackc.low %vm887_vm6, %vm886_vm5  ;;  %v927_v53 = vsel %vm124_vm1, %v1862_v0, %v925_v21 }
 0x50e   :  { %1548 = vmatprep.subr.bf16.mxu0 %v1728_v52  ;;  %vm1561_vm3 = vmpackc.low %vm889_vm0, %vm888_vm15 }
 0x511   :  { %1550 = vmatpush3.bf16.msk.msra.mxu0 %vm1549_vm9, %v1729_v60  ;;  %vm1564_vm9 = vmpackc.low %vm891_vm7, %vm890_vm4 }
 0x512   :  { %1551 = vmatprep.subr.bf16.mxu0 %v1728_v52 }
 0x515   :  { %1553 = vmatpush3.bf16.msk.msra.mxu0 %vm1552_vm8, %v1729_v60 }
 0x516   :  { %1554 = vmatprep.subr.bf16.mxu0 %v1728_v52 }
 0x519   :  { %1556 = vmatpush3.bf16.msk.msra.mxu0 %vm1555_vm2, %v1729_v60 }
 0x51a   :  { %1557 = vmatprep.subr.bf16.mxu0 %v1728_v52 }
 0x51d   :  { %1559 = vmatpush3.bf16.msk.msra.mxu0 %vm1558_vm10, %v1729_v60 }
 0x51e   :  { %1560 = vmatprep.subr.bf16.mxu0 %v1728_v52 }
 0x521   :  { %1562 = vmatpush3.bf16.msk.msra.mxu0 %vm1561_vm3, %v1729_v60 }
 0x522   :  { %1563 = vmatprep.subr.bf16.mxu0 %v1728_v52 }
 0x525   :  { %1565 = vmatpush3.bf16.msk.msra.mxu0 %vm1564_vm9, %v1729_v60 }
 0x528   :  { %1431 = vmatmul.mubr.f32.vlgmr.msra.gmra.mrb[4].mxu0 %v927_v53 }
 0x5fb   :  { %v994_v57 = vpop.f32.mrb[4].mxu0 }
 0x5fc   :  { %v998_v58 = vmul.f32 1.442695, %v994_v57  ;;  %v1432_v59 = vpop.f32.mrb[5].mxu0 }
 0x5fe   :  { %1711 = vpow2.f32 %v998_v58 }
 0x608   :  { %v1712_v1 = vpop.eup %1711 }
 0x609   :  { %v1000_v6 = vmul.f32 0.1, %v1712_v1 }
 0x60b   :  { %v1001_v11 = vadd.f32 0.028125, %v1000_v6 }
 0x60d   :  { %1713 = vrcp.f32 %v1001_v11 }
 0x617   :  { %v1714_v12 = vpop.eup %1713 }
 0x618   :  { %v1003_v16 = vmul.f32 %v1714_v12, %v1712_v1 }
 0x61a   :  { %v1005_v52 = vrot.slane %v1003_v16, 1 }
 0x61c   :  { %1466 = vmatmul.mubr.f32.vlgmr.msra.gmra.mrb[8].mxu1 %v1005_v52 }
 0x6ef   :  { %v1073_v17 = vpop.f32.mrb[8].mxu1 }
 0x6f0   :  { %v1078_v18 = vrot.slane %v1073_v17, 7  ;;  %v1467_v23 = vpop.f32.mrb[9].mxu1 }
 0x6f2   :  { %1715 = vrcp.f32 %v1078_v18 }
 0x6fc   :  { %v1716_v60 = vpop.eup %1715 }
 0x6fd   :  { %v1081_v3 = vmul.f32 %v1716_v60, %v1003_v16 }
 0x6ff   :  { %v1082_v0 = vsel %vm124_vm1, %v994_v57, %v1081_v3 }
 0x700   :  { %1083 = vst [vmem:[%s2187_s3] sm:$0x3] %v1082_v0 }

</bundles_post_ra>
